<compile_context>
chip_gen: v6e
topology: v6e:2x2x1
jax: 0.10.0
libtpu: 0.0.40
codegen_flags: <defaults>
</compile_context>

<pallas_src>
import functools

import jax
import jax.numpy as jnp
from jax.experimental import pallas as pl
from jax.experimental.pallas import tpu as pltpu


# ---------------------------------------------------------------------------
# Fused kernel: conv7x7/2 + BN + ReLU -> maxpool3x3/2 -> 1x1 proj + ReLU
#               -> global avg pool -> embed Linear      (one image per grid step)
# ---------------------------------------------------------------------------

def _encoder_kernel(x_ref, wc_ref, bc_ref, wpj_ref, bpj_ref, we_ref, be_ref,
                    o_ref, shift_ref, *, ho, hp, wp, c_stem, inv_hw):
    """x_ref    : (1, ho*wo, Kpad) bf16  lane-dense im2col, rows ordered (r, col_parity, j)
       wc_ref   : (Kpad, C)  bf16        folded conv+BN weight (K zero-padded to 256)
       bc_ref   : (1, C)     f32         folded BN bias
       wpj_ref  : (C, Cf)    bf16        1x1 projection conv weight (bottleneck stand-in)
       bpj_ref  : (1, Cf)    f32
       we_ref   : (Cf, E)    bf16        embed Linear weight
       be_ref   : (1, E)     f32
       o_ref    : (1, 1, E)  f32
       shift_ref: (ho, wp, C) f32 VMEM   staging buffer for the column "-1" shift
    """
    c = c_stem

    # ---- conv 7x7/stride2 (+ folded BN) as ONE wide-K bf16 matmul, f32 accumulation ----
    y = jnp.dot(x_ref[0], wc_ref[...], preferred_element_type=jnp.float32)   # (ho*wo, C)
    y = jnp.maximum(y + bc_ref[...], 0.0)                                    # ReLU => y >= 0

    # ---- maxpool 3x3 / stride 2 / pad 1 on the VPU via parity-split shifted views ----
    # NOTE: the zero fill at the -1 borders below is equivalent to -inf padding ONLY
    # because the pool consumes post-ReLU (>= 0) values; keep ReLU before the pool.
    y4 = y.reshape(ho, 2, wp, c)          # (conv row r, col parity, j, C); rows pre-ordered
    ce = y4[:, 0]                         # conv[r, 2j]
    co = y4[:, 1]                         # conv[r, 2j+1]
    # conv[r, 2j-1] == co[r, j-1]; realize the sublane shift via a VMEM staging buffer.
    shift_ref[:, 0:1, :] = jnp.zeros((ho, 1, c), jnp.float32)
    shift_ref[:, 1:, :] = co[:, :wp - 1, :]
    cm = jnp.maximum(jnp.maximum(ce, co), shift_ref[...])    # max over cols {2j-1,2j,2j+1}

    cm4 = cm.reshape(hp, 2, wp, c)        # (i, row parity, j, C)
    re_ = cm4[:, 0]                       # conv row 2i
    ro_ = cm4[:, 1]                       # conv row 2i+1
    ro_m1 = jnp.concatenate(              # conv row 2i-1 (zero at i=0)
        [jnp.zeros((1, wp, c), jnp.float32), ro_[:hp - 1]], axis=0)
    pooled = jnp.maximum(jnp.maximum(re_, ro_), ro_m1)        # (hp, wp, C)

    # ---- 1x1 projection conv + ReLU (bottleneck stand-in) -> global avg pool -> embed ----
    pm = pooled.reshape(hp * wp, c).astype(jnp.bfloat16)
    feat = jnp.maximum(jnp.dot(pm, wpj_ref[...], preferred_element_type=jnp.float32)
                       + bpj_ref[...], 0.0)                   # (hp*wp, Cf)
    gap = (jnp.sum(feat, axis=0, keepdims=True) * inv_hw).astype(jnp.bfloat16)   # (1, Cf)
    o_ref[0] = (jnp.dot(gap, we_ref[...], preferred_element_type=jnp.float32)
                + be_ref[...])


def _fused_encoder(col, wc, bc, wpj, bpj, we, be, *, ho, hp, wp, c_stem):
    n, m, kpad = col.shape
    e = we.shape[1]
    kernel = functools.partial(_encoder_kernel, ho=ho, hp=hp, wp=wp,
                               c_stem=c_stem, inv_hw=1.0 / float(hp * wp))
    out = pl.pallas_call(
        kernel,
        out_shape=jax.ShapeDtypeStruct((n, 1, e), jnp.float32),
        grid=(n,),
        in_specs=[
            pl.BlockSpec((1, m, kpad), lambda i: (i, 0, 0)),
            pl.BlockSpec(wc.shape, lambda i: (0, 0)),
            pl.BlockSpec(bc.shape, lambda i: (0, 0)),
            pl.BlockSpec(wpj.shape, lambda i: (0, 0)),
            pl.BlockSpec(bpj.shape, lambda i: (0, 0)),
            pl.BlockSpec(we.shape, lambda i: (0, 0)),
            pl.BlockSpec(be.shape, lambda i: (0, 0)),
        ],
        out_specs=pl.BlockSpec((1, 1, e), lambda i: (i, 0, 0)),
        scratch_shapes=[pltpu.VMEM((ho, wp, c_stem), jnp.float32)],
        compiler_params=pltpu.CompilerParams(
            dimension_semantics=("parallel",),
            vmem_limit_bytes=48 * 1024 * 1024),
    )(col, wc, bc, wpj, bpj, we, be)
    return out.reshape(n, e)


# ---------------------------------------------------------------------------
# Parameters & plain-JAX glue (wrapper does only O(input)-sized layout prep)
# ---------------------------------------------------------------------------

def init_params(key, *, c_in=3, c_stem=128, c_feat=256, embed_size=128):
    ks = jax.random.split(key, 8)
    p = {}
    # stem conv 7x7 stride 2 pad 3 (torch layout (cout, cin, kh, kw))
    p["w_stem"] = 0.1 * jax.random.normal(ks[0], (c_stem, c_in, 7, 7), jnp.float32)
    # eval-mode BatchNorm params (folded into the conv at forward time)
    p["bn_gamma"] = 1.0 + 0.1 * jax.random.normal(ks[1], (c_stem,), jnp.float32)
    p["bn_beta"] = 0.1 * jax.random.normal(ks[2], (c_stem,), jnp.float32)
    p["bn_mean"] = 0.1 * jax.random.normal(ks[3], (c_stem,), jnp.float32)
    p["bn_var"] = jnp.abs(1.0 + 0.1 * jax.random.normal(ks[4], (c_stem,), jnp.float32))
    # TODO(synk): the 16 pretrained bottleneck blocks (resnet layer1..layer4) cannot be
    # reproduced without the torchvision weights; stood in by a 1x1 projection conv + ReLU
    # with lane-friendly (multiple-of-128) channel counts.
    p["w_proj"] = 0.1 * jax.random.normal(ks[5], (c_stem, c_feat), jnp.float32)
    p["b_proj"] = 0.1 * jax.random.normal(ks[6], (1, c_feat), jnp.float32)
    # embed Linear(resnet.fc.in_features -> embed_size), stored pre-transposed
    p["w_embed"] = 0.1 * jax.random.normal(ks[7], (c_feat, embed_size), jnp.float32)
    p["b_embed"] = jnp.zeros((1, embed_size), jnp.float32)
    return p


@jax.jit
def encoder_cnn_forward(params, images):
    n, c_in, h, w = images.shape
    c_stem = params["w_stem"].shape[0]
    eps = 1e-5
    assert h % 32 == 0 and w % 32 == 0, "demo assumes H, W divisible by 32 (so wp % 8 == 0)"
    ho, wo = h // 2, w // 2          # conv7x7 / stride 2 / pad 3 output
    hp, wp = ho // 2, wo // 2        # maxpool3x3 / stride 2 / pad 1 output

    # NHWC: the only layout transform of activations in the whole pipeline.
    x = images.transpose(0, 2, 3, 1)

    # Fold eval-mode BN into the conv weight/bias.
    scale = params["bn_gamma"] / jnp.sqrt(params["bn_var"] + eps)
    w_fold = params["w_stem"] * scale[:, None, None, None]               # (c_stem, cin, 7, 7)
    b_fold = (params["bn_beta"] - params["bn_mean"] * scale).reshape(1, c_stem)

    # Conv weight as a single (K, C) matmul operand; K ordered (ky, kx, cin), zero-padded
    # to 256 to fill the MXU contraction depth (pad rows are zero => result unchanged).
    k_real = 49 * c_in
    k_pad = max(256, ((k_real + 127) // 128) * 128)
    wm = w_fold.transpose(2, 3, 1, 0).reshape(k_real, c_stem)
    wm = jnp.pad(wm, ((0, k_pad - k_real), (0, 0))).astype(jnp.bfloat16)

    # Lane-dense bf16 im2col, rows ordered (conv row r, col parity s, col index j) so the
    # in-kernel maxpool needs only leading-axis slices plus one sublane shift.
    xp = jnp.pad(x, ((0, 0), (3, 3), (3, 3), (0, 0)))
    cols = [xp[:, ky:ky + 2 * ho:2, kx:kx + 2 * wo:2, :]
            for ky in range(7) for kx in range(7)]
    col = jnp.stack(cols, axis=3).reshape(n, ho, wo, k_real)
    col = (col.reshape(n, ho, wp, 2, k_real)
              .transpose(0, 1, 3, 2, 4)
              .reshape(n, ho * wo, k_real))
    col = jnp.pad(col, ((0, 0), (0, 0), (0, k_pad - k_real))).astype(jnp.bfloat16)

    return _fused_encoder(col, wm, b_fold,
                          params["w_proj"].astype(jnp.bfloat16), params["b_proj"],
                          params["w_embed"].astype(jnp.bfloat16), params["b_embed"],
                          ho=ho, hp=hp, wp=wp, c_stem=c_stem)


# ---------------------------------------------------------------------------
# Pure-jnp reference (same bf16-operand / f32-accumulation math)
# ---------------------------------------------------------------------------

def reference_forward(params, images):
    eps = 1e-5
    n, c_in, h, w = images.shape
    c_stem = params["w_stem"].shape[0]
    ho, wo = h // 2, w // 2
    hp, wp = ho // 2, wo // 2

    x = images.transpose(0, 2, 3, 1)
    scale = params["bn_gamma"] / jnp.sqrt(params["bn_var"] + eps)
    w_fold = params["w_stem"] * scale[:, None, None, None]
    b_fold = params["bn_beta"] - params["bn_mean"] * scale

    xp = jnp.pad(x, ((0, 0), (3, 3), (3, 3), (0, 0))).astype(jnp.bfloat16)
    cols = [xp[:, dy:dy + 2 * ho:2, dx:dx + 2 * wo:2, :]
            for dy in range(7) for dx in range(7)]
    patches = jnp.stack(cols, axis=3).reshape(n * ho * wo, 49 * c_in)
    wm = w_fold.transpose(2, 3, 1, 0).reshape(49 * c_in, c_stem).astype(jnp.bfloat16)
    conv = jnp.dot(patches, wm, preferred_element_type=jnp.float32)
    y = jnp.maximum(conv.reshape(n, ho, wo, c_stem) + b_fold, 0.0)

    yp = jnp.pad(y, ((0, 0), (1, 1), (1, 1), (0, 0)), constant_values=-jnp.inf)
    views = [yp[:, dy:dy + 2 * hp:2, dx:dx + 2 * wp:2, :]
             for dy in range(3) for dx in range(3)]
    pooled = jnp.max(jnp.stack(views, 0), axis=0).astype(jnp.bfloat16)

    feat = jnp.maximum(
        jnp.dot(pooled.reshape(n * hp * wp, c_stem),
                params["w_proj"].astype(jnp.bfloat16),
                preferred_element_type=jnp.float32) + params["b_proj"], 0.0)
    gap = feat.reshape(n, hp * wp, -1).mean(axis=1).astype(jnp.bfloat16)
    return jnp.dot(gap, params["w_embed"].astype(jnp.bfloat16),
                   preferred_element_type=jnp.float32) + params["b_embed"]


if __name__ == "__main__":
    key = jax.random.PRNGKey(0)
    k_img, k_par = jax.random.split(key)
    images = jax.random.normal(k_img, (2, 3, 32, 32), jnp.float32)     # NCHW like torch
    params = init_params(k_par, embed_size=128)

    out = jax.block_until_ready(encoder_cnn_forward(params, images))
    assert out.shape == (2, 128) and out.dtype == jnp.float32

    ref = reference_forward(params, images)
    max_err = float(jnp.max(jnp.abs(out - ref)))
    assert jnp.allclose(out, ref, rtol=2e-2, atol=2e-2), f"mismatch vs reference, max err {max_err}"

    print("KERNEL_OK")
</pallas_src>

<mosaic_0001>
module attributes {stable_mosaic.version = 11 : i64} {
  func.func @_encoder_kernel(%arg0: i32, %arg1: memref<1x256x256xbf16, #tpu.memory_space<vmem>>, %arg2: memref<256x128xbf16, #tpu.memory_space<vmem>>, %arg3: memref<1x128xf32, #tpu.memory_space<vmem>>, %arg4: memref<128x256xbf16, #tpu.memory_space<vmem>>, %arg5: memref<1x256xf32, #tpu.memory_space<vmem>>, %arg6: memref<256x128xbf16, #tpu.memory_space<vmem>>, %arg7: memref<1x128xf32, #tpu.memory_space<vmem>>, %arg8: memref<1x1x128xf32, #tpu.memory_space<vmem>>, %arg9: memref<16x8x128xf32, #tpu.memory_space<vmem>>) attributes {dimension_semantics = [#tpu.dimension_semantics<parallel>], iteration_bounds = array<i64: 2>, scalar_prefetch = 0 : i64, scratch_operands = 1 : i64, tpu.core_type = #tpu.core_type<tc>, window_params = [{transform_indices = @transform_0, window_bounds = array<i64: 1, 256, 256>}, {pipeline_mode = #tpu.pipeline_mode<synchronous>, transform_indices = @transform_1, window_bounds = array<i64: 256, 128>}, {pipeline_mode = #tpu.pipeline_mode<synchronous>, transform_indices = @transform_2, window_bounds = array<i64: 1, 128>}, {pipeline_mode = #tpu.pipeline_mode<synchronous>, transform_indices = @transform_3, window_bounds = array<i64: 128, 256>}, {pipeline_mode = #tpu.pipeline_mode<synchronous>, transform_indices = @transform_4, window_bounds = array<i64: 1, 256>}, {pipeline_mode = #tpu.pipeline_mode<synchronous>, transform_indices = @transform_5, window_bounds = array<i64: 256, 128>}, {pipeline_mode = #tpu.pipeline_mode<synchronous>, transform_indices = @transform_6, window_bounds = array<i64: 1, 128>}, {transform_indices = @transform_7, window_bounds = array<i64: 1, 1, 128>}]} {
    %c0 = arith.constant 0 : index
    %c0_0 = arith.constant 0 : index
    %c0_1 = arith.constant 0 : index
    %0 = vector.load %arg1[%c0, %c0_0, %c0_1] : memref<1x256x256xbf16, #tpu.memory_space<vmem>>, vector<1x256x256xbf16>
    %1 = vector.shape_cast %0 : vector<1x256x256xbf16> to vector<256x256xbf16>
    %c0_2 = arith.constant 0 : index
    %c0_3 = arith.constant 0 : index
    %2 = vector.load %arg2[%c0_2, %c0_3] : memref<256x128xbf16, #tpu.memory_space<vmem>>, vector<256x128xbf16>
    %cst = arith.constant dense<0.000000e+00> : vector<256x128xf32>
    %3 = tpu.matmul %1, %2, %cst {dimension_numbers = #tpu.dot_dimension_numbers<[1], [0], [0], [1], [0, 0, 1, 1], [], []>} : vector<256x256xbf16>, vector<256x128xbf16>, vector<256x128xf32> -> vector<256x128xf32>
    %c0_4 = arith.constant 0 : index
    %c0_5 = arith.constant 0 : index
    %4 = vector.load %arg3[%c0_4, %c0_5] : memref<1x128xf32, #tpu.memory_space<vmem>>, vector<1x128xf32>
    %5 = vector.broadcast %4 : vector<1x128xf32> to vector<256x128xf32>
    %6 = arith.addf %3, %5 : vector<256x128xf32>
    %cst_6 = arith.constant 0.000000e+00 : f32
    %7 = vector.broadcast %cst_6 : f32 to vector<256x128xf32>
    %8 = arith.maximumf %6, %7 : vector<256x128xf32>
    %9 = vector.shape_cast %8 : vector<256x128xf32> to vector<16x2x8x128xf32>
    %10 = vector.extract_strided_slice %9 {offsets = [0, 0, 0, 0], sizes = [16, 1, 8, 128], strides = [1, 1, 1, 1]} : vector<16x2x8x128xf32> to vector<16x1x8x128xf32>
    %11 = vector.shape_cast %10 : vector<16x1x8x128xf32> to vector<16x8x128xf32>
    %12 = vector.extract_strided_slice %9 {offsets = [0, 1, 0, 0], sizes = [16, 1, 8, 128], strides = [1, 1, 1, 1]} : vector<16x2x8x128xf32> to vector<16x1x8x128xf32>
    %13 = vector.shape_cast %12 : vector<16x1x8x128xf32> to vector<16x8x128xf32>
    %cst_7 = arith.constant 0.000000e+00 : f32
    %14 = vector.broadcast %cst_7 : f32 to vector<16x1x128xf32>
    %c0_8 = arith.constant 0 : index
    %c0_9 = arith.constant 0 : index
    %c0_10 = arith.constant 0 : index
    %15 = vector.load %arg9[%c0_8, %c0_9, %c0_10] : memref<16x8x128xf32, #tpu.memory_space<vmem>>, vector<16x1x128xf32>
    tpu.vector_store %arg9[%c0_8, %c0_9, %c0_10], %14 {strides = array<i32>} : memref<16x8x128xf32, #tpu.memory_space<vmem>>, vector<16x1x128xf32>,
    %16 = vector.extract_strided_slice %13 {offsets = [0, 0, 0], sizes = [16, 7, 128], strides = [1, 1, 1]} : vector<16x8x128xf32> to vector<16x7x128xf32>
    %c0_11 = arith.constant 0 : index
    %c1 = arith.constant 1 : index
    %c0_12 = arith.constant 0 : index
    %17 = vector.load %arg9[%c0_11, %c1, %c0_12] : memref<16x8x128xf32, #tpu.memory_space<vmem>>, vector<16x7x128xf32>
    tpu.vector_store %arg9[%c0_11, %c1, %c0_12], %16 {strides = array<i32>} : memref<16x8x128xf32, #tpu.memory_space<vmem>>, vector<16x7x128xf32>,
    %18 = arith.maximumf %11, %13 : vector<16x8x128xf32>
    %c0_13 = arith.constant 0 : index
    %c0_14 = arith.constant 0 : index
    %c0_15 = arith.constant 0 : index
    %19 = vector.load %arg9[%c0_13, %c0_14, %c0_15] : memref<16x8x128xf32, #tpu.memory_space<vmem>>, vector<16x8x128xf32>
    %20 = arith.maximumf %18, %19 : vector<16x8x128xf32>
    %21 = vector.shape_cast %20 : vector<16x8x128xf32> to vector<8x2x8x128xf32>
    %22 = vector.extract_strided_slice %21 {offsets = [0, 0, 0, 0], sizes = [8, 1, 8, 128], strides = [1, 1, 1, 1]} : vector<8x2x8x128xf32> to vector<8x1x8x128xf32>
    %23 = vector.shape_cast %22 : vector<8x1x8x128xf32> to vector<8x8x128xf32>
    %24 = vector.extract_strided_slice %21 {offsets = [0, 1, 0, 0], sizes = [8, 1, 8, 128], strides = [1, 1, 1, 1]} : vector<8x2x8x128xf32> to vector<8x1x8x128xf32>
    %25 = vector.shape_cast %24 : vector<8x1x8x128xf32> to vector<8x8x128xf32>
    %cst_16 = arith.constant 0.000000e+00 : f32
    %26 = vector.broadcast %cst_16 : f32 to vector<1x8x128xf32>
    %27 = vector.extract_strided_slice %25 {offsets = [0, 0, 0], sizes = [7, 8, 128], strides = [1, 1, 1]} : vector<8x8x128xf32> to vector<7x8x128xf32>
    %28 = tpu.concatenate %26, %27 in 0 : vector<1x8x128xf32>, vector<7x8x128xf32> -> vector<8x8x128xf32>
    %29 = arith.maximumf %23, %25 : vector<8x8x128xf32>
    %30 = arith.maximumf %29, %28 : vector<8x8x128xf32>
    %31 = vector.shape_cast %30 : vector<8x8x128xf32> to vector<64x128xf32>
    %32 = arith.truncf %31 : vector<64x128xf32> to vector<64x128xbf16>
    %c0_17 = arith.constant 0 : index
    %c0_18 = arith.constant 0 : index
    %33 = vector.load %arg4[%c0_17, %c0_18] : memref<128x256xbf16, #tpu.memory_space<vmem>>, vector<128x256xbf16>
    %cst_19 = arith.constant dense<0.000000e+00> : vector<64x256xf32>
    %34 = tpu.matmul %32, %33, %cst_19 {dimension_numbers = #tpu.dot_dimension_numbers<[1], [0], [0], [1], [0, 0, 1, 1], [], []>} : vector<64x128xbf16>, vector<128x256xbf16>, vector<64x256xf32> -> vector<64x256xf32>
    %c0_20 = arith.constant 0 : index
    %c0_21 = arith.constant 0 : index
    %35 = vector.load %arg5[%c0_20, %c0_21] : memref<1x256xf32, #tpu.memory_space<vmem>>, vector<1x256xf32>
    %36 = vector.broadcast %35 : vector<1x256xf32> to vector<64x256xf32>
    %37 = arith.addf %34, %36 : vector<64x256xf32>
    %cst_22 = arith.constant 0.000000e+00 : f32
    %38 = vector.broadcast %cst_22 : f32 to vector<64x256xf32>
    %39 = arith.maximumf %37, %38 : vector<64x256xf32>
    %cst_23 = arith.constant dense<0.000000e+00> : vector<256xf32>
    %40 = vector.multi_reduction <add>, %39, %cst_23 [0] : vector<64x256xf32> to vector<256xf32>
    %41 = vector.shape_cast %40 : vector<256xf32> to vector<1x256xf32>
    %cst_24 = arith.constant 1.562500e-02 : f32
    %42 = vector.broadcast %cst_24 : f32 to vector<1x256xf32>
    %43 = arith.mulf %41, %42 : vector<1x256xf32>
    %44 = arith.truncf %43 : vector<1x256xf32> to vector<1x256xbf16>
    %c0_25 = arith.constant 0 : index
    %c0_26 = arith.constant 0 : index
    %45 = vector.load %arg6[%c0_25, %c0_26] : memref<256x128xbf16, #tpu.memory_space<vmem>>, vector<256x128xbf16>
    %cst_27 = arith.constant dense<0.000000e+00> : vector<1x128xf32>
    %46 = tpu.matmul %44, %45, %cst_27 {dimension_numbers = #tpu.dot_dimension_numbers<[1], [0], [0], [1], [0, 0, 1, 1], [], []>} : vector<1x256xbf16>, vector<256x128xbf16>, vector<1x128xf32> -> vector<1x128xf32>
    %c0_28 = arith.constant 0 : index
    %c0_29 = arith.constant 0 : index
    %47 = vector.load %arg7[%c0_28, %c0_29] : memref<1x128xf32, #tpu.memory_space<vmem>>, vector<1x128xf32>
    %48 = arith.addf %46, %47 : vector<1x128xf32>
    %c0_30 = arith.constant 0 : index
    %c0_31 = arith.constant 0 : index
    %c0_32 = arith.constant 0 : index
    %49 = vector.load %arg8[%c0_30, %c0_31, %c0_32] : memref<1x1x128xf32, #tpu.memory_space<vmem>>, vector<1x1x128xf32>
    %50 = vector.shape_cast %49 : vector<1x1x128xf32> to vector<1x128xf32>
    %51 = vector.shape_cast %48 : vector<1x128xf32> to vector<1x1x128xf32>
    tpu.vector_store %arg8[%c0_30, %c0_31, %c0_32], %51 {strides = array<i32>} : memref<1x1x128xf32, #tpu.memory_space<vmem>>, vector<1x1x128xf32>,
    return
  }
  func.func @transform_0(%arg0: i32) -> (i32, i32, i32) {
    %c0_i32 = arith.constant 0 : i32
    %c0_i32_0 = arith.constant 0 : i32
    %c0_i32_1 = arith.constant 0 : i32
    return %arg0, %c0_i32, %c0_i32_0 : i32, i32, i32
  }
  func.func @transform_1(%arg0: i32) -> (i32, i32) {
    %c0_i32 = arith.constant 0 : i32
    %c0_i32_0 = arith.constant 0 : i32
    %c0_i32_1 = arith.constant 0 : i32
    return %c0_i32, %c0_i32_0 : i32, i32
  }
  func.func @transform_2(%arg0: i32) -> (i32, i32) {
    %c0_i32 = arith.constant 0 : i32
    %c0_i32_0 = arith.constant 0 : i32
    %c0_i32_1 = arith.constant 0 : i32
    return %c0_i32, %c0_i32_0 : i32, i32
  }
  func.func @transform_3(%arg0: i32) -> (i32, i32) {
    %c0_i32 = arith.constant 0 : i32
    %c0_i32_0 = arith.constant 0 : i32
    %c0_i32_1 = arith.constant 0 : i32
    return %c0_i32, %c0_i32_0 : i32, i32
  }
  func.func @transform_4(%arg0: i32) -> (i32, i32) {
    %c0_i32 = arith.constant 0 : i32
    %c0_i32_0 = arith.constant 0 : i32
    %c0_i32_1 = arith.constant 0 : i32
    return %c0_i32, %c0_i32_0 : i32, i32
  }
  func.func @transform_5(%arg0: i32) -> (i32, i32) {
    %c0_i32 = arith.constant 0 : i32
    %c0_i32_0 = arith.constant 0 : i32
    %c0_i32_1 = arith.constant 0 : i32
    return %c0_i32, %c0_i32_0 : i32, i32
  }
  func.func @transform_6(%arg0: i32) -> (i32, i32) {
    %c0_i32 = arith.constant 0 : i32
    %c0_i32_0 = arith.constant 0 : i32
    %c0_i32_1 = arith.constant 0 : i32
    return %c0_i32, %c0_i32_0 : i32, i32
  }
  func.func @transform_7(%arg0: i32) -> (i32, i32, i32) {
    %c0_i32 = arith.constant 0 : i32
    %c0_i32_0 = arith.constant 0 : i32
    %c0_i32_1 = arith.constant 0 : i32
    return %arg0, %c0_i32, %c0_i32_0 : i32, i32, i32
  }
}

</mosaic_0001>

<bundles_post_ra>
// kernel: encoder_cnn_forward.1
= control target key start
LH: loop header
LB: loop body
LE: loop exit
PB: predicated region body
PF: predicated region fallthrough
CT: control target
= control target key end

     0   :  { %12 = vsyncpa [#allocation4], 0  ;;  %s2228_s0 = inlined_call_operand.vmem [shape: bf16[2,256,256], index: 0, kind: input, shape index: {}]   ;;  %s2229_s1 = inlined_call_operand.vmem [shape: bf16[256,128], index: 1, kind: input, shape index: {}]   ;;  %s2230_s2 = inlined_call_operand.vmem [shape: f32[1,128], index: 2, kind: input, shape index: {}]   ;;  %s2231_s3 = inlined_call_operand.vmem [shape: bf16[128,256], index: 3, kind: input, shape index: {}]   ;;  %s2232_s4 = inlined_call_operand.vmem [shape: f32[1,256], index: 4, kind: input, shape index: {}]   ;;  %s2233_s5 = inlined_call_operand.vmem [shape: bf16[256,128], index: 5, kind: input, shape index: {}]   ;;  %s2234_s6 = inlined_call_operand.vmem [shape: f32[1,128], index: 6, kind: input, shape index: {}]   ;;  %s2235_s7 = inlined_call_operand.hbm [shape: f32[2,1,128], index: 7, kind: output, shape index: {}]  }
   0x1   :  { %14 = vsyncpa [#allocation4 + $0x1], 0  ;;  %s1853_s24 = smov 0   ;;  %s1855_s25 = smov 0  }
   0x2   :  { %s1857_s26 = smov 0   ;;  %s1859_s27 = smov 0  }
   0x3 LB: > { %s1874_s28 = sadd.s32 4294967295, %s1808_s27   ;;  %s1362_s29 = sadd.s32 4294967294, %s1808_s27   ;;  %s1808_s27 = sphi %s1859_s27, %s2241_s27   ;;  %s1804_s26 = sphi %s1857_s26, %s2240_s26   ;;  %s1800_s25 = sphi %s1855_s25, %s2239_s25   ;;  %s1796_s24 = sphi %s1853_s24, %s2238_s24  }
   0x4   : > { %s1878_s30 = sadd.s32 1, %s1808_s27   ;;  %s179_s8 = sadd.s32 1, %s1804_s26 }
   0x5   : > { %s176_s9 = ssub.s32 %s1808_s27, %s1878_s30  ;;  %p189_p0 = scmp.ne.s32.totalorder %s1804_s26, %s1800_s25 }
   0x6   : > { %p177_p1 = scmp.eq.s32.totalorder %s176_s9, 0  ;;  %p190_p2 = scmp.eq.s32.totalorder %s1874_s28, 1 }
   0x7   : > { %p195_p3 = scmp.ne.s32.totalorder %s1800_s25, %s1796_s24  ;;  %p196_p4 = scmp.eq.s32.totalorder %s1362_s29, 1 }
   0x8   : > { %s1889_s10 = scalar_select %p177_p1, %s1804_s26, %s179_s8  }
   0x9   : > { %p1891_p5 = por %p190_p2, %p189_p0  ;;  %p1895_p6 = por %p196_p4, %p195_p3 }
   0xa   : > { %p1365_p7 = scmp.ge.s32.totalorder %s1808_s27, 1  ;;  %p240_p8 = scmp.lt.s32.totalorder %s1808_s27, 3 }
   0xc   : > { %p241_p9 = pnand %p1365_p7, %p240_p8 }
   0xd   : > { %p271_p10 = scmp.lt.s32.totalorder (!%p241_p9), %s1874_s28, 1  ;;  %s269_s20 = sand.u32 (!%p241_p9), 1, %s1800_s25  }
   0xe   : > { %244 = sbr.rel (%p241_p9) target bundleno = 795 (0x31b), region = 48  ;;  %s270_s29 = scalar_lea.vmem (!%p241_p9), [#allocation3], %s269_s20 }
   0xf   : > { %s1295_s15 = scalar_lea.sflag (!%p241_p9), [#allocation4], %s269_s20 }
  0x13   : > { %v1644_v0 = vld [vmem:[%s2229_s1 + $0x78] sm:$0xff]   ;;  %v1646_v2 = vld [vmem:[%s2229_s1 + $0x70] sm:$0xff]   ;;  %v1648_v4 = vld [vmem:[%s2229_s1 + $0x68] sm:$0xff]   ;;  %s272_s8 = scalar_select %p271_p10, %s1874_s28, 1  ;;  %v1810_v48 = vmov 0.0  }
  0x14   : > { %v1645_v1 = vld [vmem:[%s2229_s1 + $0x38] sm:$0xff]   ;;  %1453 = vmatprep.subr.bf16.mxu0 %v1644_v0  ;;  %1587 = vmatprep.subr.bf16.mxu1 %v1644_v0  ;;  %v1647_v3 = vld [vmem:[%s2229_s1 + $0x30] sm:$0xff]   ;;  %v1649_v5 = vld [vmem:[%s2229_s1 + $0x28] sm:$0xff]   ;;  %797 = vst [vmem:[#allocation2] sm:$0x1] %v1810_v48 }
  0x15   : > { %1454 = vmatpush3.bf16.msra.mxu0 %v1645_v1  ;;  %1595 = vmatpush3.bf16.msra.mxu1 %v1645_v1  ;;  %v1650_v6 = vld [vmem:[%s2229_s1 + $0x60] sm:$0xff]   ;;  %s1452_s16 = sshll.u32 %s272_s8, 8  ;;  %v1652_v8 = vld [vmem:[%s2229_s1 + $0x58] sm:$0xff]   ;;  %v1654_v10 = vld [vmem:[%s2229_s1 + $0x50] sm:$0xff]   ;;  %798 = vst [vmem:[#allocation2 + $0x8] sm:$0x1] %v1810_v48 }
  0x16   : > { %1455 = vmatprep.subr.bf16.mxu0 %v1646_v2  ;;  %1588 = vmatprep.subr.bf16.mxu1 %v1646_v2  ;;  %v1651_v7 = vld [vmem:[%s2229_s1 + $0x20] sm:$0xff]   ;;  %s1933_s21 = scalar_lea.vmem %s2228_s0, %s1452_s16  ;;  %v1653_v9 = vld [vmem:[%s2229_s1 + $0x18] sm:$0xff]   ;;  %v1655_v12 = vld [vmem:[%s2229_s1 + $0x10] sm:$0xff]   ;;  %799 = vst [vmem:[#allocation2 + $0x10] sm:$0x1] %v1810_v48  ;;  %v1811_v1 = vmov 0  }
  0x17   : > { %v1662_v11 = vld [vmem:[%s1933_s21 + $0x4] ss:$8 sps:$4 sm:$0xff]   ;;  %v1668_v13 = vld [vmem:[%s1933_s21 + $0xb4] ss:$8 sps:$4 sm:$0xff]   ;;  %v1660_v18 = vld [vmem:[%s1933_s21] ss:$8 sps:$4 sm:$0xff]  }
  0x18   : > { %v1656_v14 = vld [vmem:[%s2229_s1 + $0x48] sm:$0xff]   ;;  %636 = vmatprep.mubr.bf16.mxu0 %v1662_v11  ;;  %724 = vmatprep.mubr.bf16.mxu1 %v1668_v13  ;;  %v1658_v16 = vld [vmem:[%s2229_s1 + $0x40] sm:$0xff]   ;;  %v1666_v19 = vld [vmem:[%s1933_s21 + $0xb0] ss:$8 sps:$4 sm:$0xff]   ;;  %800 = vst [vmem:[#allocation2 + $0x18] sm:$0x1] %v1810_v48 }
  0x19   : > { %1456 = vmatpush3.bf16.msra.mxu0 %v1647_v3  ;;  %1596 = vmatpush3.bf16.msra.mxu1 %v1647_v3  ;;  %v1657_v15 = vld [vmem:[%s2229_s1 + $0x8] sm:$0xff]   ;;  %v1659_v17 = vld [vmem:[%s2229_s1] sm:$0xff]   ;;  %v1663_v20 = vld [vmem:[%s1933_s21 + $0x14] ss:$8 sps:$4 sm:$0xff]   ;;  %801 = vst [vmem:[#allocation2 + $0x20] sm:$0x1] %v1810_v48 }
  0x1a   : > { %1457 = vmatprep.subr.bf16.mxu0 %v1648_v4  ;;  %1589 = vmatprep.subr.bf16.mxu1 %v1648_v4  ;;  %v1672_v21 = vld [vmem:[%s1933_s21 + $0xc4] ss:$8 sps:$4 sm:$0xff]   ;;  %v1665_v22 = vld [vmem:[%s1933_s21 + $0x10] ss:$8 sps:$4 sm:$0xff]   ;;  %v1674_v23 = vld [vmem:[%s1933_s21 + $0xc0] ss:$8 sps:$4 sm:$0xff]  }
  0x1b   : > { %v1669_v24 = vld [vmem:[%s1933_s21 + $0x24] ss:$8 sps:$4 sm:$0xff]   ;;  %v1678_v25 = vld [vmem:[%s1933_s21 + $0xd4] ss:$8 sps:$4 sm:$0xff]   ;;  %v1671_v26 = vld [vmem:[%s1933_s21 + $0x20] ss:$8 sps:$4 sm:$0xff]  }
  0x1c   : > { %v1680_v27 = vld [vmem:[%s1933_s21 + $0xd0] ss:$8 sps:$4 sm:$0xff]   ;;  %v1675_v28 = vld [vmem:[%s1933_s21 + $0x34] ss:$8 sps:$4 sm:$0xff]   ;;  %v1684_v29 = vld [vmem:[%s1933_s21 + $0xe4] ss:$8 sps:$4 sm:$0xff]  }
  0x1d   : > { %1458 = vmatpush3.bf16.msra.mxu0 %v1649_v5  ;;  %1597 = vmatpush3.bf16.msra.mxu1 %v1649_v5  ;;  %v1677_v30 = vld [vmem:[%s1933_s21 + $0x30] ss:$8 sps:$4 sm:$0xff]   ;;  %v1686_v31 = vld [vmem:[%s1933_s21 + $0xe0] ss:$8 sps:$4 sm:$0xff]   ;;  %v1681_v32 = vld [vmem:[%s1933_s21 + $0x44] ss:$8 sps:$4 sm:$0xff]  }
  0x1e   : > { %1459 = vmatprep.subr.bf16.mxu0 %v1650_v6  ;;  %1590 = vmatprep.subr.bf16.mxu1 %v1650_v6  ;;  %v1690_v33 = vld [vmem:[%s1933_s21 + $0xf4] ss:$8 sps:$4 sm:$0xff]   ;;  %v1683_v34 = vld [vmem:[%s1933_s21 + $0x40] ss:$8 sps:$4 sm:$0xff]   ;;  %v1692_v35 = vld [vmem:[%s1933_s21 + $0xf0] ss:$8 sps:$4 sm:$0xff]  }
  0x1f   : > { %v1687_v36 = vld [vmem:[%s1933_s21 + $0x54] ss:$8 sps:$4 sm:$0xff]   ;;  %v1689_v37 = vld [vmem:[%s1933_s21 + $0x50] ss:$8 sps:$4 sm:$0xff]   ;;  %v1693_v38 = vld [vmem:[%s1933_s21 + $0x64] ss:$8 sps:$4 sm:$0xff]  }
  0x20   : > { %v1695_v39 = vld [vmem:[%s1933_s21 + $0x60] ss:$8 sps:$4 sm:$0xff]   ;;  %v1696_v40 = vld [vmem:[%s1933_s21 + $0x74] ss:$8 sps:$4 sm:$0xff]   ;;  %v1698_v41 = vld [vmem:[%s1933_s21 + $0x70] ss:$8 sps:$4 sm:$0xff]  }
  0x21   : > { %1460 = vmatpush3.bf16.msra.mxu0 %v1651_v7  ;;  %1598 = vmatpush3.bf16.msra.mxu1 %v1651_v7  ;;  %v1699_v42 = vld [vmem:[%s1933_s21 + $0x84] ss:$8 sps:$4 sm:$0xff]   ;;  %v1701_v43 = vld [vmem:[%s1933_s21 + $0x80] ss:$8 sps:$4 sm:$0xff]   ;;  %v1702_v44 = vld [vmem:[%s1933_s21 + $0x94] ss:$8 sps:$4 sm:$0xff]  }
  0x22   : > { %1461 = vmatprep.subr.bf16.mxu0 %v1652_v8  ;;  %1591 = vmatprep.subr.bf16.mxu1 %v1652_v8  ;;  %v1704_v45 = vld [vmem:[%s1933_s21 + $0x90] ss:$8 sps:$4 sm:$0xff]   ;;  %v1705_v46 = vld [vmem:[%s1933_s21 + $0xa4] ss:$8 sps:$4 sm:$0xff]   ;;  %v1707_v47 = vld [vmem:[%s1933_s21 + $0xa0] ss:$8 sps:$4 sm:$0xff]  }
  0x23   : > { %802 = vst [vmem:[#allocation2 + $0x28] sm:$0x1] %v1810_v48  ;;  %803 = vst [vmem:[#allocation2 + $0x30] sm:$0x1] %v1810_v48  ;;  %v1710_v49 = vld [vmem:[%s2231_s3 + $0x74] ss:$8 sps:$4 sm:$0xff]  }
  0x24   : > { %804 = vst [vmem:[#allocation2 + $0x38] sm:$0x1] %v1810_v48  ;;  %805 = vst [vmem:[#allocation2 + $0x40] sm:$0x1] %v1810_v48  ;;  %v1708_v50 = vld [vmem:[%s2231_s3 + $0x70] ss:$8 sps:$4 sm:$0xff]  }
  0x25   : > { %1462 = vmatpush3.bf16.msra.mxu0 %v1653_v9  ;;  %1599 = vmatpush3.bf16.msra.mxu1 %v1653_v9  ;;  %806 = vst [vmem:[#allocation2 + $0x48] sm:$0x1] %v1810_v48  ;;  %807 = vst [vmem:[#allocation2 + $0x50] sm:$0x1] %v1810_v48  ;;  %v1713_v51 = vld [vmem:[%s2231_s3 + $0x64] ss:$8 sps:$4 sm:$0xff]  }
  0x26   : > { %1463 = vmatprep.subr.bf16.mxu0 %v1654_v10  ;;  %1592 = vmatprep.subr.bf16.mxu1 %v1654_v10  ;;  %808 = vst [vmem:[#allocation2 + $0x58] sm:$0x1] %v1810_v48  ;;  %809 = vst [vmem:[#allocation2 + $0x60] sm:$0x1] %v1810_v48  ;;  %v1711_v52 = vld [vmem:[%s2231_s3 + $0x60] ss:$8 sps:$4 sm:$0xff]  }
  0x27   : > { %810 = vst [vmem:[#allocation2 + $0x68] sm:$0x1] %v1810_v48  ;;  %811 = vst [vmem:[#allocation2 + $0x70] sm:$0x1] %v1810_v48  ;;  %v1716_v53 = vld [vmem:[%s2231_s3 + $0x54] ss:$8 sps:$4 sm:$0xff]  }
  0x28   : > { %812 = vst [vmem:[#allocation2 + $0x78] sm:$0x1] %v1810_v48  ;;  %v1714_v54 = vld [vmem:[%s2231_s3 + $0x50] ss:$8 sps:$4 sm:$0xff]   ;;  %v1719_v55 = vld [vmem:[%s2231_s3 + $0x44] ss:$8 sps:$4 sm:$0xff]  }
  0x29   : > { %1464 = vmatpush3.bf16.msra.mxu0 %v1655_v12  ;;  %1600 = vmatpush3.bf16.msra.mxu1 %v1655_v12  ;;  %v1717_v56 = vld [vmem:[%s2231_s3 + $0x40] ss:$8 sps:$4 sm:$0xff]   ;;  %v1722_v57 = vld [vmem:[%s2231_s3 + $0x34] ss:$8 sps:$4 sm:$0xff]   ;;  %v1720_v58 = vld [vmem:[%s2231_s3 + $0x30] ss:$8 sps:$4 sm:$0xff]  }
  0x2a   : > { %1465 = vmatprep.subr.bf16.mxu0 %v1656_v14  ;;  %1593 = vmatprep.subr.bf16.mxu1 %v1656_v14  ;;  %v1725_v59 = vld [vmem:[%s2231_s3 + $0x24] ss:$8 sps:$4 sm:$0xff]   ;;  %v1723_v60 = vld [vmem:[%s2231_s3 + $0x20] ss:$8 sps:$4 sm:$0xff]   ;;  %v1728_v61 = vld [vmem:[%s2231_s3 + $0x14] ss:$8 sps:$4 sm:$0xff]  }
  0x2b   : > { %v1726_v62 = vld [vmem:[%s2231_s3 + $0x10] ss:$8 sps:$4 sm:$0xff]   ;;  %v1731_v63 = vld [vmem:[%s2231_s3 + $0x4] ss:$8 sps:$4 sm:$0xff]   ;;  %v1729_v0 = vld [vmem:[%s2231_s3] ss:$8 sps:$4 sm:$0xff]  }
  0x2c   : > { %v2044_v7 = vld [vmem:[%s2230_s2] ss:$0 sm:$0xff]  ;;  %s1449_s21 = sshll.u32 %s1874_s28, 4  ;;  %s1307_s8 = sshll.u32 %s270_s29, 4  ;;  %s1308_s8 = int_to_ptr.vmem [resolvable:$true] %s1307_s8 }
  0x2d   : > { %1466 = vmatpush3.bf16.msra.mxu0 %v1657_v15  ;;  %1601 = vmatpush3.bf16.msra.mxu1 %v1657_v15  ;;  %s2193_s14 = scalar_lea.hbm %s2235_s7, %s1449_s21  ;;  %s1748_s16 = scalar_lea.vmem %s1308_s8, 16 }
  0x2e   : > { %1467 = vmatprep.subr.bf16.mxu0 %v1658_v16  ;;  %1594 = vmatprep.subr.bf16.mxu1 %v1658_v16  ;;  %p1749_p11 = scmp.ne.s32.totalorder %s1308_s8, %s1748_s16  ;;  %s1812_s28 = smov [#allocation3]  }
  0x2f   : > { %s1752_s17 = sshll.u32 %s1812_s28, 4  ;;  %s1753_s17 = int_to_ptr.vmem [resolvable:$false] %s1752_s17 }
  0x30   : > { %p1750_p12 = pnand %p1749_p11, %p1891_p5  ;;  %s1754_s18 = scalar_lea.vmem %s1753_s17, 32 }
  0x31   : > { %1468 = vmatpush3.bf16.msra.mxu0 %v1659_v17  ;;  %1602 = vmatpush3.bf16.msra.mxu1 %v1659_v17  ;;  %p1755_p0 = scmp.lt.s32.totalorder %s1308_s8, %s1753_s17  ;;  %p1756_p1 = scmp.lt.s32.totalorder %s1754_s18, %s1748_s16 }
  0x32   : > { %1005 = vmatprep.subr.bf16.mxu1 %v1710_v49  ;;  %p1751_p13 = pneg %p1750_p12 }
  0x33   : > { %p1757_p2 = por %p1756_p1, %p1755_p0 }
  0x34   : > { %637 = vmatmul.mubr.bf16.vlgmr.msra.gmra.mxu0 %v1660_v18  ;;  %725 = vmatmul.mubr.bf16.vlgmr.msra.gmra.mxu1 %v1666_v19 }
  0x35   : > { %644 = vmatprep.mubr.bf16.mxu0 %v1663_v20  ;;  %732 = vmatprep.mubr.bf16.mxu1 %v1672_v21  ;;  %p1758_p3 = pnand %p1757_p2, %p1751_p13 }
  0x36   : > { %1006 = vmatpush1.bf16.msra.mxu1 %v1708_v50 }
  0x37   : > { %1007 = vmatprep.subr.bf16.mxu1 %v1713_v51 }
  0x3a   : > { %1008 = vmatpush1.bf16.msra.mxu1 %v1711_v52 }
  0x3b   : > { %1009 = vmatprep.subr.bf16.mxu1 %v1716_v53 }
  0x3c   : > { %645 = vmatmul.mubr.bf16.gmra.mxu0 %v1665_v22  ;;  %733 = vmatmul.mubr.bf16.gmra.mxu1 %v1674_v23 }
  0x3d   : > { %652 = vmatprep.mubr.bf16.mxu0 %v1669_v24  ;;  %740 = vmatprep.mubr.bf16.mxu1 %v1678_v25 }
  0x3e   : > { %1010 = vmatpush1.bf16.msra.mxu1 %v1714_v54 }
  0x3f   : > { %1011 = vmatprep.subr.bf16.mxu1 %v1719_v55 }
  0x42   : > { %1012 = vmatpush1.bf16.msra.mxu1 %v1717_v56 }
  0x43   : > { %1013 = vmatprep.subr.bf16.mxu1 %v1722_v57 }
  0x44   : > { %653 = vmatmul.mubr.bf16.gmra.mxu0 %v1671_v26  ;;  %741 = vmatmul.mubr.bf16.gmra.mxu1 %v1680_v27 }
  0x45   : > { %660 = vmatprep.mubr.bf16.mxu0 %v1675_v28  ;;  %748 = vmatprep.mubr.bf16.mxu1 %v1684_v29 }
  0x46   : > { %1014 = vmatpush1.bf16.msra.mxu1 %v1720_v58 }
  0x47   : > { %1015 = vmatprep.subr.bf16.mxu1 %v1725_v59 }
  0x4a   : > { %1016 = vmatpush1.bf16.msra.mxu1 %v1723_v60 }
  0x4b   : > { %1017 = vmatprep.subr.bf16.mxu1 %v1728_v61 }
  0x4c   : > { %661 = vmatmul.mubr.bf16.gmra.mxu0 %v1677_v30  ;;  %749 = vmatmul.mubr.bf16.gmra.mxu1 %v1686_v31 }
  0x4d   : > { %668 = vmatprep.mubr.bf16.mxu0 %v1681_v32  ;;  %756 = vmatprep.mubr.bf16.mxu1 %v1690_v33 }
  0x4e   : > { %1018 = vmatpush1.bf16.msra.mxu1 %v1726_v62 }
  0x4f   : > { %1019 = vmatprep.subr.bf16.mxu1 %v1731_v63 }
  0x52   : > { %1020 = vmatpush1.bf16.msra.mxu1 %v1729_v0 }
  0x54   : > { %669 = vmatmul.mubr.bf16.gmra.mxu0 %v1683_v34  ;;  %757 = vmatmul.mubr.bf16.gmra.mxu1 %v1692_v35 }
  0x55   : > { %676 = vmatprep.mubr.bf16.mxu0 %v1687_v36  ;;  %1037 = vmatprep.mubr.bf16.mxu1 %v1811_v1 }
  0x5c   : > { %677 = vmatmul.mubr.bf16.gmra.mxu0 %v1689_v37 }
  0x5d   : > { %684 = vmatprep.mubr.bf16.mxu0 %v1693_v38 }
  0x64   : > { %685 = vmatmul.mubr.bf16.gmra.mxu0 %v1695_v39 }
  0x65   : > { %692 = vmatprep.mubr.bf16.mxu0 %v1696_v40 }
  0x6c   : > { %693 = vmatmul.mubr.bf16.gmra.mxu0 %v1698_v41 }
  0x6d   : > { %700 = vmatprep.mubr.bf16.mxu0 %v1699_v42 }
  0x74   : > { %701 = vmatmul.mubr.bf16.gmra.mxu0 %v1701_v43 }
  0x75   : > { %708 = vmatprep.mubr.bf16.mxu0 %v1702_v44 }
  0x7c   : > { %709 = vmatmul.mubr.bf16.gmra.mxu0 %v1704_v45 }
  0x7d   : > { %716 = vmatprep.mubr.bf16.mxu0 %v1705_v46 }
  0x84   : > { %717 = vmatmul.mubr.bf16.gmra.mxu0 %v1707_v47 }
  0xf4   : > { %v2037_v2 = vpop.f32.mrf.mxu0  ;;  %v1535_v3 = vpop.f32.mrf.mxu1 }
  0xf6   : > { %v2039_v4 = vpop.f32.mrf.mxu0  ;;  %v1536_v5 = vpop.f32.mrf.mxu1 }
  0xf7   : > { %v1537_v6 = vadd.f32 %v1536_v5, %v1535_v3  ;;  %v1471_v0 = vadd.f32 %v2039_v4, %v2037_v2 }
  0xf8   : > { %v1472_v8 = vpop.f32.mrf.mxu0  ;;  %v1538_v9 = vpop.f32.mrf.mxu1 }
  0xf9   : > { %v727_v10 = vadd.f32 %v1537_v6, %v2044_v7  ;;  %v639_v2 = vadd.f32 %v1471_v0, %v2044_v7 }
  0xfa   : > { %v1473_v11 = vpop.f32.mrf.mxu0  ;;  %v1539_v12 = vpop.f32.mrf.mxu1 }
  0xfb   : > { %v1474_v13 = vadd.f32 %v1473_v11, %v1472_v8  ;;  %v1540_v14 = vadd.f32 %v1539_v12, %v1538_v9  ;;  %v787_v18 = vmax.f32 %v727_v10, 0.0 }
  0xfc   : > { %v1475_v15 = vpop.f32.mrf.mxu0  ;;  %v1541_v16 = vpop.f32.mrf.mxu1 }
  0xfd   : > { %v2048_v17 = vadd.f32 %v1474_v13, %v2044_v7  ;;  %v730_v19 = vadd.f32 %v1540_v14, %v2044_v7 }
  0xfe   : > { %v1476_v20 = vpop.f32.mrf.mxu0  ;;  %v1542_v21 = vpop.f32.mrf.mxu1 }
  0xff   : > { %v766_v22 = vmax.f32 %v2048_v17, 0.0  ;;  %v788_v23 = vmax.f32 %v730_v19, 0.0  ;;  %v1543_v24 = vadd.f32 %v1542_v21, %v1541_v16  ;;  %v1477_v61 = vadd.f32 %v1476_v20, %v1475_v15 }
 0x100   : > { %v1478_v25 = vpop.f32.mrf.mxu0  ;;  %v1544_v26 = vpop.f32.mrf.mxu1 }
 0x101   : > { %813 = vst [vmem:[#allocation2 + $0x1] sm:$0x7f] %v766_v22  ;;  %824 = vst [vmem:[#allocation2 + $0x59] sm:$0x7f] %v788_v23  ;;  %v2054_v27 = vmax.f32 %v787_v18, %v788_v23  ;;  %v735_v29 = vadd.f32 %v1543_v24, %v2044_v7  ;;  %v647_v11 = vadd.f32 %v1477_v61, %v2044_v7 }
 0x102   : > { %v1479_v28 = vpop.f32.mrf.mxu0  ;;  %v1545_v30 = vpop.f32.mrf.mxu1 }
 0x103   : > { %v1480_v31 = vadd.f32 %v1479_v28, %v1478_v25  ;;  %v1546_v32 = vadd.f32 %v1545_v30, %v1544_v26  ;;  %v789_v38 = vmax.f32 %v735_v29, 0.0  ;;  %v767_v29 = vmax.f32 %v647_v11, 0.0 }
 0x104   : > { %v1481_v33 = vpop.f32.mrf.mxu0  ;;  %v1547_v34 = vpop.f32.mrf.mxu1 }
 0x105   : > { %v2058_v35 = vadd.f32 %v1480_v31, %v2044_v7  ;;  %v738_v36 = vadd.f32 %v1546_v32, %v2044_v7 }
 0x106   : > { %v1482_v37 = vpop.f32.mrf.mxu0  ;;  %v1548_v39 = vpop.f32.mrf.mxu1 }
 0x107   : > { %v768_v40 = vmax.f32 %v2058_v35, 0.0  ;;  %v790_v41 = vmax.f32 %v738_v36, 0.0  ;;  %v1549_v42 = vadd.f32 %v1548_v39, %v1547_v34  ;;  %v1483_v12 = vadd.f32 %v1482_v37, %v1481_v33 }
 0x108   : > { %v1484_v43 = vpop.f32.mrf.mxu0  ;;  %v1550_v44 = vpop.f32.mrf.mxu1  ;;  %v856_v4 = vld [vmem:[#allocation2 + $0x58] sm:$0xff]  ;;  %v765_v39 = vmax.f32 %v639_v2, 0.0 }
 0x109   : > { %814 = vst [vmem:[#allocation2 + $0x9] sm:$0x7f] %v768_v40  ;;  %825 = vst [vmem:[#allocation2 + $0x61] sm:$0x7f] %v790_v41  ;;  %v2064_v46 = vmax.f32 %v789_v38, %v790_v41  ;;  %v743_v47 = vadd.f32 %v1549_v42, %v2044_v7  ;;  %v655_v30 = vadd.f32 %v1483_v12, %v2044_v7 }
 0x10a   : > { %v1485_v45 = vpop.f32.mrf.mxu0  ;;  %v1551_v48 = vpop.f32.mrf.mxu1  ;;  %v2089_v37 = vmax.f32 %v2054_v27, %v856_v4  ;;  %v830_v41 = vmax.f32 %v767_v29, %v768_v40  ;;  %v829_v27 = vmax.f32 %v765_v39, %v766_v22 }
 0x10b   : > { %v1486_v49 = vadd.f32 %v1485_v45, %v1484_v43  ;;  %v1552_v50 = vadd.f32 %v1551_v48, %v1550_v44  ;;  %v791_v56 = vmax.f32 %v743_v47, 0.0  ;;  %v845_v45 = vld [vmem:[#allocation2] sm:$0xff] }
 0x10c   : > { %v1487_v51 = vpop.f32.mrf.mxu0  ;;  %v1553_v52 = vpop.f32.mrf.mxu1 }
 0x10d   : > { %v2068_v53 = vadd.f32 %v1486_v49, %v2044_v7  ;;  %v746_v54 = vadd.f32 %v1552_v50, %v2044_v7  ;;  %v769_v50 = vmax.f32 %v655_v30, 0.0 }
 0x10e   : > { %v1488_v55 = vpop.f32.mrf.mxu0  ;;  %v1554_v57 = vpop.f32.mrf.mxu1 }
 0x10f   : > { %v770_v58 = vmax.f32 %v2068_v53, 0.0  ;;  %v792_v59 = vmax.f32 %v746_v54, 0.0  ;;  %v1555_v60 = vadd.f32 %v1554_v57, %v1553_v52  ;;  %v1489_v14 = vadd.f32 %v1488_v55, %v1487_v51 }
 0x110   : > { %v1490_v62 = vpop.f32.mrf.mxu0  ;;  %v1556_v63 = vpop.f32.mrf.mxu1  ;;  %v857_v13 = vld [vmem:[#allocation2 + $0x60] sm:$0xff]  ;;  %v846_v36 = vld [vmem:[#allocation2 + $0x8] sm:$0xff] }
 0x111   : > { %815 = vst [vmem:[#allocation2 + $0x11] sm:$0x7f] %v770_v58  ;;  %826 = vst [vmem:[#allocation2 + $0x69] sm:$0x7f] %v792_v59  ;;  %v842_v5 = vmax.f32 %v791_v56, %v792_v59  ;;  %v751_v6 = vadd.f32 %v1555_v60, %v2044_v7  ;;  %v873_v24 = vmax.f32 %v2064_v46, %v857_v13 }
 0x112   : > { %v1491_v3 = vpop.f32.mrf.mxu0  ;;  %v1557_v8 = vpop.f32.mrf.mxu1  ;;  %v663_v31 = vadd.f32 %v1489_v14, %v2044_v7  ;;  %v862_v49 = vmax.f32 %v830_v41, %v846_v36  ;;  %v861_v56 = vmax.f32 %v829_v27, %v845_v45  ;;  %v831_v17 = vmax.f32 %v769_v50, %v770_v58 }
 0x113   : > { %v1492_v9 = vadd.f32 %v1491_v3, %v1490_v62  ;;  %v1558_v10 = vadd.f32 %v1557_v8, %v1556_v63  ;;  %v793_v21 = vmax.f32 %v751_v6, 0.0 }
 0x114   : > { %v2078_v15 = vpop.f32.mrf.mxu0  ;;  %v1559_v16 = vpop.f32.mrf.mxu1  ;;  %v771_v51 = vmax.f32 %v663_v31, 0.0  ;;  %v877_v0 = vmax.f32 %v861_v56, %v862_v49 }
 0x115   : > { %v666_v18 = vadd.f32 %v1492_v9, %v2044_v7  ;;  %v754_v19 = vadd.f32 %v1558_v10, %v2044_v7 }
 0x116   : > { %v2083_v20 = vpop.f32.mrf.mxu0  ;;  %v1560_v23 = vpop.f32.mrf.mxu1  ;;  %v885_v58 = vmax.f32 %v877_v0, 0.0 }
 0x117   : > { %v772_v25 = vmax.f32 %v666_v18, 0.0  ;;  %v794_v26 = vmax.f32 %v754_v19, 0.0  ;;  %v1561_v28 = vadd.f32 %v1560_v23, %v1559_v16  ;;  %v1495_v39 = vadd.f32 %v2083_v20, %v2078_v15 }
 0x118   : > { %v858_v32 = vld [vmem:[#allocation2 + $0x68] sm:$0xff]  ;;  %v1496_v33 = vpop.f32.mrf.mxu0  ;;  %v1562_v34 = vpop.f32.mrf.mxu1  ;;  %v847_v57 = vld [vmem:[#allocation2 + $0x10] sm:$0xff] }
 0x119   : > { %816 = vst [vmem:[#allocation2 + $0x19] sm:$0x7f] %v772_v25  ;;  %v2091_v38 = vmax.f32 %v842_v5, %v858_v32  ;;  %827 = vst [vmem:[#allocation2 + $0x71] sm:$0x7f] %v794_v26  ;;  %v843_v43 = vmax.f32 %v793_v21, %v794_v26  ;;  %v759_v35 = vadd.f32 %v1561_v28, %v2044_v7 }
 0x11a   : > { %v1497_v42 = vpop.f32.mrf.mxu0  ;;  %v1563_v44 = vpop.f32.mrf.mxu1  ;;  %v832_v22 = vmax.f32 %v771_v51, %v772_v25  ;;  %v863_v3 = vmax.f32 %v831_v17, %v847_v57 }
 0x11b   : > { %v1498_v46 = vadd.f32 %v1497_v42, %v1496_v33  ;;  %v1564_v47 = vadd.f32 %v1563_v44, %v1562_v34  ;;  %v883_v48 = vmax.f32 %v873_v24, %v2091_v38  ;;  %v795_v6 = vmax.f32 %v759_v35, 0.0 }
 0x11c   : > { %v1499_v52 = vpop.f32.mrf.mxu0 }
 0x11d   : > { %v2099_v54 = vadd.f32 %v1498_v46, %v2044_v7  ;;  %v762_v40 = vadd.f32 %v1564_v47, %v2044_v7  ;;  %v891_v55 = vmax.f32 %v883_v48, %v2089_v37 }
 0x11e   : > { %v1500_v59 = vpop.f32.mrf.mxu0 }
 0x11f   : > { %v774_v60 = vmax.f32 %v2099_v54, 0.0  ;;  %v796_v61 = vmax.f32 %v762_v40, 0.0  ;;  %v1501_v36 = vadd.f32 %v1500_v59, %v1499_v52 }
 0x120   : > { %v848_v62 = vld [vmem:[#allocation2 + $0x18] sm:$0xff]  ;;  %v1502_v63 = vpop.f32.mrf.mxu0  ;;  %v859_v11 = vld [vmem:[#allocation2 + $0x70] sm:$0xff] }
 0x121   : > { %v2107_v5 = vmax.f32 %v832_v22, %v848_v62  ;;  %817 = vst [vmem:[#allocation2 + $0x21] sm:$0x7f] %v774_v60  ;;  %828 = vst [vmem:[#allocation2 + $0x79] sm:$0x7f] %v796_v61  ;;  %v844_v14 = vmax.f32 %v795_v6, %v796_v61  ;;  %v875_v18 = vmax.f32 %v843_v43, %v859_v11 }
 0x122   : > { %v1503_v8 = vpop.f32.mrf.mxu0  ;;  %v679_v44 = vadd.f32 %v1501_v36, %v2044_v7 }
 0x123   : > { %v878_v9 = vmax.f32 %v863_v3, %v2107_v5  ;;  %v1504_v10 = vadd.f32 %v1503_v8, %v1502_v63 }
 0x124   : > { %v1505_v53 = vpop.f32.mrf.mxu0  ;;  %v775_v50 = vmax.f32 %v679_v44, 0.0 }
 0x125   : > { %v886_v12 = vmax.f32 %v878_v9, %v862_v49  ;;  %v682_v13 = vadd.f32 %v1504_v10, %v2044_v7 }
 0x126   : > { %v1506_v16 = vpop.f32.mrf.mxu0 }
 0x127   : > { %v776_v19 = vmax.f32 %v682_v13, 0.0  ;;  %v893_v2 = vpack.c.bf16 %v886_v12, %v885_v58  ;;  %v1507_v45 = vadd.f32 %v1506_v16, %v1505_v53 }
 0x128   : > { %v860_v4 = vld [vmem:[#allocation2 + $0x78] sm:$0xff]  ;;  %v1508_v21 = vpop.f32.mrf.mxu0  ;;  %v849_v56 = vld [vmem:[#allocation2 + $0x20] sm:$0xff] }
 0x129   : > { %818 = vst [vmem:[#allocation2 + $0x29] sm:$0x7f] %v776_v19  ;;  %v876_v23 = vmax.f32 %v844_v14, %v860_v4  ;;  %1038 = vmatmul.mubr.bf16.vlgmr.msra.gmra.mxu1 %v893_v2  ;;  %v687_v51 = vadd.f32 %v1507_v45, %v2044_v7  ;;  %v834_v35 = vmax.f32 %v775_v50, %v776_v19 }
 0x12a   : > { %v1509_v24 = vpop.f32.mrf.mxu0  ;;  %1047 = vmatprep.mubr.bf16.mxu1 %v1811_v1 }
 0x12b   : > { %v1510_v25 = vadd.f32 %v1509_v24, %v1508_v21  ;;  %v884_v26 = vmax.f32 %v875_v18, %v876_v23  ;;  %v777_v17 = vmax.f32 %v687_v51, 0.0 }
 0x12c   : > { %v1511_v28 = vpop.f32.mrf.mxu0 }
 0x12d   : > { %v690_v29 = vadd.f32 %v1510_v25, %v2044_v7  ;;  %v892_v30 = vmax.f32 %v884_v26, %v2091_v38  ;;  %v671_v38 = vadd.f32 %v1495_v39, %v2044_v7 }
 0x12e   : > { %v1512_v31 = vpop.f32.mrf.mxu0 }
 0x12f   : > { %v778_v32 = vmax.f32 %v690_v29, 0.0  ;;  %v2114_v33 = vpack.c.bf16 %v892_v30, %v891_v55  ;;  %v1513_v46 = vadd.f32 %v1512_v31, %v1511_v28  ;;  %v773_v15 = vmax.f32 %v671_v38, 0.0 }
 0x130   : > { %v1514_v34 = vpop.f32.mrf.mxu0  ;;  %v850_v20 = vld [vmem:[#allocation2 + $0x28] sm:$0xff] }
 0x131   : > { %819 = vst [vmem:[#allocation2 + $0x31] sm:$0x7f] %v778_v32  ;;  %v695_v52 = vadd.f32 %v1513_v46, %v2044_v7  ;;  %v833_v55 = vmax.f32 %v773_v15, %v774_v60  ;;  %v866_v59 = vmax.f32 %v834_v35, %v850_v20  ;;  %v835_v3 = vmax.f32 %v777_v17, %v778_v32  ;;  %v1733_v20 = vld [vmem:[%s2233_s5 + $0x38] sm:$0xff]   ;;  %v1738_v35 = vld [vmem:[%s2233_s5 + $0x60] sm:$0xff]   ;;  %v1744_v17 = vld [vmem:[%s2233_s5 + $0x48] sm:$0xff]  }
 0x132   : > { %v1515_v41 = vpop.f32.mrf.mxu0 }
 0x133   : > { %v1516_v42 = vadd.f32 %v1515_v41, %v1514_v34  ;;  %v779_v22 = vmax.f32 %v695_v52, 0.0  ;;  %v865_v0 = vmax.f32 %v833_v55, %v849_v56  ;;  %v1740_v55 = vld [vmem:[%s2233_s5 + $0x58] sm:$0xff]  }
 0x134   : > { %v1517_v43 = vpop.f32.mrf.mxu0  ;;  %v1741_v56 = vld [vmem:[%s2233_s5 + $0x18] sm:$0xff]  }
 0x135   : > { %v698_v47 = vadd.f32 %v1516_v42, %v2044_v7  ;;  %v879_v58 = vmax.f32 %v865_v0, %v866_v59 }
 0x136   : > { %v1518_v48 = vpop.f32.mrf.mxu0 }
 0x137   : > { %v780_v27 = vmax.f32 %v698_v47, 0.0  ;;  %v887_v18 = vmax.f32 %v879_v58, %v2107_v5  ;;  %v1519_v26 = vadd.f32 %v1518_v48, %v1517_v43  ;;  %v913_v58 = vld [vmem:[%s2232_s4] sm:$0x3] }
 0x138   : > { %v1520_v49 = vpop.f32.mrf.mxu0  ;;  %v851_v62 = vld [vmem:[#allocation2 + $0x30] sm:$0xff] }
 0x139   : > { %820 = vst [vmem:[#allocation2 + $0x39] sm:$0x7f] %v780_v27  ;;  %v836_v6 = vmax.f32 %v779_v22, %v780_v27  ;;  %v867_v11 = vmax.f32 %v835_v3, %v851_v62  ;;  %v703_v5 = vadd.f32 %v1519_v26, %v2044_v7  ;;  %v1745_v22 = vld [vmem:[%s2233_s5 + $0x8] sm:$0xff]   ;;  %v1747_v62 = vld [vmem:[%s2233_s5] sm:$0xff]  }
 0x13a   : > { %v1521_v54 = vpop.f32.mrf.mxu0 }
 0x13b   : > { %v1522_v40 = vadd.f32 %v1521_v54, %v1520_v49  ;;  %v781_v41 = vmax.f32 %v703_v5, 0.0  ;;  %v1737_v54 = vld [vmem:[%s2233_s5 + $0x28] sm:$0xff]  }
 0x13c   : > { %v1523_v57 = vpop.f32.mrf.mxu0 }
 0x13d   : > { %v706_v61 = vadd.f32 %v1522_v40, %v2044_v7  ;;  %v1739_v40 = vld [vmem:[%s2233_s5 + $0x20] sm:$0xff]  }
 0x13e   : > { %v1524_v63 = vpop.f32.mrf.mxu0 }
 0x13f   : > { %v782_v8 = vmax.f32 %v706_v61, 0.0  ;;  %v1525_v24 = vadd.f32 %v1524_v63, %v1523_v57  ;;  %v1742_v57 = vld [vmem:[%s2233_s5 + $0x50] sm:$0xff]   ;;  %v1746_v61 = vld [vmem:[%s2233_s5 + $0x40] sm:$0xff]  }
 0x140   : > { %v852_v9 = vld [vmem:[#allocation2 + $0x38] sm:$0xff]  ;;  %v1526_v10 = vpop.f32.mrf.mxu0 }
 0x141   : > { %v868_v53 = vmax.f32 %v836_v6, %v852_v9  ;;  %821 = vst [vmem:[#allocation2 + $0x41] sm:$0x7f] %v782_v8  ;;  %v711_v29 = vadd.f32 %v1525_v24, %v2044_v7  ;;  %v837_v45 = vmax.f32 %v781_v41, %v782_v8  ;;  %v915_v6 = vlaneseq }
 0x142   : > { %v1527_v60 = vpop.f32.mrf.mxu0 }
 0x143   : > { %v1528_v12 = vadd.f32 %v1527_v60, %v1526_v10  ;;  %v880_v13 = vmax.f32 %v867_v11, %v868_v53  ;;  %v783_v34 = vmax.f32 %v711_v29, 0.0  ;;  %v916_v10 = vshrl.u32 %v915_v6, 7 }
 0x144   : > { %v1529_v14 = vpop.f32.mrf.mxu0 }
 0x145   : > { %v714_v16 = vadd.f32 %v1528_v12, %v2044_v7  ;;  %v888_v19 = vmax.f32 %v880_v13, %v866_v59  ;;  %v1743_v59 = vld [vmem:[%s2233_s5 + $0x10] sm:$0xff]   ;;  %v921_v60 = vsub.s32 1, %v916_v10 }
 0x146   : > { %v1530_v2 = vpop.f32.mrf.mxu0 }
 0x147   : > { %v784_v4 = vmax.f32 %v714_v16, 0.0  ;;  %v894_v21 = vpack.c.bf16 %v888_v19, %v887_v18  ;;  %v1531_v30 = vadd.f32 %v1530_v2, %v1529_v14  ;;  %v922_v14 = vrot.slane %v913_v58, %v921_v60 }
 0x148   : > { %v1532_v23 = vpop.f32.mrf.mxu0  ;;  %v853_v44 = vld [vmem:[#allocation2 + $0x40] sm:$0xff] }
 0x149   : > { %822 = vst [vmem:[#allocation2 + $0x49] sm:$0x7f] %v784_v4  ;;  %1048 = vmatmul.mubr.bf16.gmra.mxu1 %v894_v21  ;;  %v719_v36 = vadd.f32 %v1531_v30, %v2044_v7  ;;  %v838_v42 = vmax.f32 %v783_v34, %v784_v4  ;;  %v869_v47 = vmax.f32 %v837_v45, %v853_v44 }
 0x14a   : > { %v1533_v25 = vpop.f32.mrf.mxu0  ;;  %1057 = vmatprep.mubr.bf16.mxu1 %v1811_v1 }
 0x14b   : > { %v1534_v28 = vadd.f32 %v1533_v25, %v1532_v23  ;;  %v785_v43 = vmax.f32 %v719_v36, 0.0 }
 0x14d   : > { %v722_v31 = vadd.f32 %v1534_v28, %v2044_v7  ;;  %v1732_v7 = vld [vmem:[%s2233_s5 + $0x78] sm:$0xff]  }
 0x14e   : > { %1565 = vmatprep.subr.bf16.mxu1 %v1732_v7 }
 0x14f   : > { %v786_v32 = vmax.f32 %v722_v31, 0.0  ;;  %1566 = vmatpush3.bf16.msra.mxu1 %v1733_v20 }
 0x150   : > { %v854_v39 = vld [vmem:[#allocation2 + $0x48] sm:$0xff] }
 0x151   : > { %823 = vst [vmem:[#allocation2 + $0x51] sm:$0x7f] %v786_v32  ;;  %v870_v46 = vmax.f32 %v838_v42, %v854_v39  ;;  %v839_v38 = vmax.f32 %v785_v43, %v786_v32 }
 0x153   : > { %v881_v49 = vmax.f32 %v869_v47, %v870_v46 }
 0x155   : > { %v889_v51 = vmax.f32 %v881_v49, %v868_v53  ;;  %v917_v53 = vsub.s32 0, %v916_v10 }
 0x157   : > { %v918_v13 = vrot.slane %v913_v58, %v917_v53 }
 0x158   : > { %v855_v48 = vld [vmem:[#allocation2 + $0x50] sm:$0xff] }
 0x159   : > { %v871_v27 = vmax.f32 %v839_v38, %v855_v48 }
 0x15b   : > { %v882_v50 = vmax.f32 %v871_v27, %v2089_v37  ;;  %v1734_v37 = vld [vmem:[%s2233_s5 + $0x70] sm:$0xff]  }
 0x15c   : > { %1567 = vmatprep.subr.bf16.mxu1 %v1734_v37 }
 0x15d   : > { %v890_v52 = vmax.f32 %v882_v50, %v870_v46 }
 0x15f   : > { %v895_v15 = vpack.c.bf16 %v890_v52, %v889_v51 }
 0x161   : > { %1058 = vmatmul.mubr.bf16.gmra.mxu1 %v895_v15 }
 0x162   : > { %1067 = vmatprep.mubr.bf16.mxu1 %v1811_v1  ;;  %v1735_v1 = vld [vmem:[%s2233_s5 + $0x30] sm:$0xff]  }
 0x163   : > { %1568 = vmatpush3.bf16.msra.mxu1 %v1735_v1 }
 0x169   : > { %1068 = vmatmul.mubr.bf16.gmra.mxu1 %v2114_v33  ;;  %v1736_v33 = vld [vmem:[%s2233_s5 + $0x68] sm:$0xff]  }
 0x16a   : > { %1569 = vmatprep.subr.bf16.mxu1 %v1736_v33 }
 0x16b   : > { %1570 = vmatpush3.bf16.msra.mxu1 %v1737_v54 }
 0x16c   : > { %1571 = vmatprep.subr.bf16.mxu1 %v1738_v35 }
 0x16f   : > { %1572 = vmatpush3.bf16.msra.mxu1 %v1739_v40 }
 0x170   : > { %1573 = vmatprep.subr.bf16.mxu1 %v1740_v55 }
 0x173   : > { %1574 = vmatpush3.bf16.msra.mxu1 %v1741_v56 }
 0x174   : > { %1575 = vmatprep.subr.bf16.mxu1 %v1742_v57 }
 0x177   : > { %1576 = vmatpush3.bf16.msra.mxu1 %v1743_v59 }
 0x178   : > { %1577 = vmatprep.subr.bf16.mxu1 %v1744_v17 }
 0x17b   : > { %1578 = vmatpush3.bf16.msra.mxu1 %v1745_v22 }
 0x17c   : > { %1579 = vmatprep.subr.bf16.mxu1 %v1746_v61 }
 0x17f   : > { %1580 = vmatpush3.bf16.msra.mxu1 %v1747_v62 }
 0x1e9   : > { %v1039_v63 = vpop.f32.mrf.mxu1 }
 0x1ea   : > { %v1040_v2 = vadd.f32 %v1039_v63, %v918_v13 }
 0x1eb   : > { %v1041_v0 = vpop.f32.mrf.mxu1 }
 0x1ec   : > { %v1042_v21 = vadd.f32 %v1041_v0, %v922_v14  ;;  %v1078_v31 = vmax.f32 %v1040_v2, 0.0 }
 0x1ed   : > { %v1043_v3 = vpop.f32.mrf.mxu1 }
 0x1ee   : > { %v1044_v16 = vadd.f32 %v1043_v3, %v918_v13  ;;  %v1079_v34 = vmax.f32 %v1042_v21, 0.0 }
 0x1ef   : > { %v1045_v8 = vpop.f32.mrf.mxu1 }
 0x1f0   : > { %v1046_v18 = vadd.f32 %v1045_v8, %v922_v14  ;;  %v1080_v25 = vmax.f32 %v1044_v16, 0.0 }
 0x1f2   : > { %v1081_v28 = vmax.f32 %v1046_v18, 0.0  ;;  %v1094_v41 = vadd.f32 %v1080_v25, %v1078_v31  ;;  %v1156_v25 = vld [vmem:[%s2234_s6] sm:$0x1] }
 0x1f4   : > { %v1107_v46 = vadd.f32 %v1081_v28, %v1079_v34 }
 0x209   : > { %v1049_v9 = vpop.f32.mrf.mxu1 }
 0x20a   : > { %v1050_v4 = vadd.f32 %v1049_v9, %v918_v13 }
 0x20b   : > { %v1051_v11 = vpop.f32.mrf.mxu1 }
 0x20c   : > { %v1052_v23 = vadd.f32 %v1051_v11, %v922_v14  ;;  %v1082_v5 = vmax.f32 %v1050_v4, 0.0 }
 0x20d   : > { %v1053_v12 = vpop.f32.mrf.mxu1 }
 0x20e   : > { %v1054_v26 = vadd.f32 %v1053_v12, %v918_v13  ;;  %v1083_v36 = vmax.f32 %v1052_v23, 0.0  ;;  %v1095_v38 = vadd.f32 %v1094_v41, %v1082_v5 }
 0x20f   : > { %v1055_v19 = vpop.f32.mrf.mxu1 }
 0x210   : > { %v1056_v29 = vadd.f32 %v1055_v19, %v922_v14  ;;  %v1084_v42 = vmax.f32 %v1054_v26, 0.0  ;;  %v1108_v49 = vadd.f32 %v1107_v46, %v1083_v36 }
 0x212   : > { %v1085_v43 = vmax.f32 %v1056_v29, 0.0  ;;  %v1096_v51 = vadd.f32 %v1095_v38, %v1084_v42 }
 0x214   : > { %v1109_v20 = vadd.f32 %v1108_v49, %v1085_v43 }
 0x221   : > { %v1059_v24 = vpop.f32.mrf.mxu1 }
 0x222   : > { %v1060_v32 = vadd.f32 %v1059_v24, %v918_v13 }
 0x223   : > { %v1061_v30 = vpop.f32.mrf.mxu1 }
 0x224   : > { %v1062_v44 = vadd.f32 %v1061_v30, %v922_v14  ;;  %v1086_v48 = vmax.f32 %v1060_v32, 0.0 }
 0x225   : > { %v1063_v39 = vpop.f32.mrf.mxu1 }
 0x226   : > { %v1064_v45 = vadd.f32 %v1063_v39, %v918_v13  ;;  %v1087_v52 = vmax.f32 %v1062_v44, 0.0  ;;  %v1097_v1 = vadd.f32 %v1096_v51, %v1086_v48 }
 0x227   : > { %v1065_v47 = vpop.f32.mrf.mxu1 }
 0x228   : > { %v1066_v27 = vadd.f32 %v1065_v47, %v922_v14  ;;  %v1088_v15 = vmax.f32 %v1064_v45, 0.0  ;;  %v1110_v55 = vadd.f32 %v1109_v20, %v1087_v52 }
 0x229   : > { %v1069_v50 = vpop.f32.mrf.mxu1 }
 0x22a   : > { %v1070_v7 = vadd.f32 %v1069_v50, %v918_v13  ;;  %v1089_v33 = vmax.f32 %v1066_v27, 0.0  ;;  %v1098_v56 = vadd.f32 %v1097_v1, %v1088_v15 }
 0x22b   : > { %v1071_v37 = vpop.f32.mrf.mxu1 }
 0x22c   : > { %v1090_v54 = vmax.f32 %v1070_v7, 0.0  ;;  %v1072_v35 = vadd.f32 %v1071_v37, %v922_v14  ;;  %v1111_v22 = vadd.f32 %v1110_v55, %v1089_v33 }
 0x22d   : > { %v1073_v40 = vpop.f32.mrf.mxu1 }
 0x22e   : > { %v1091_v57 = vmax.f32 %v1072_v35, 0.0  ;;  %v1074_v59 = vadd.f32 %v1073_v40, %v918_v13  ;;  %v1099_v61 = vadd.f32 %v1098_v56, %v1090_v54 }
 0x22f   : > { %v1075_v17 = vpop.f32.mrf.mxu1 }
 0x230   : > { %v1092_v62 = vmax.f32 %v1074_v59, 0.0  ;;  %v1076_v63 = vadd.f32 %v1075_v17, %v922_v14  ;;  %v1112_v0 = vadd.f32 %v1111_v22, %v1091_v57 }
 0x232   : > { %v1100_v3 = vadd.f32 %v1099_v61, %v1092_v62  ;;  %v1093_v6 = vmax.f32 %v1076_v63, 0.0 }
 0x234   : > { %v1101_v8 = vrot.slane %v1100_v3, 4  ;;  %v1113_v9 = vadd.f32 %v1112_v0, %v1093_v6 }
 0x236   : > { %v1102_v10 = vadd.f32 %v1101_v8, %v1100_v3  ;;  %v1114_v11 = vrot.slane %v1113_v9, 4 }
 0x238   : > { %v1103_v53 = vrot.slane %v1102_v10, 2  ;;  %v1115_v58 = vadd.f32 %v1114_v11, %v1113_v9 }
 0x23a   : > { %v1104_v60 = vadd.f32 %v1103_v53, %v1102_v10  ;;  %v1116_v12 = vrot.slane %v1115_v58, 2 }
 0x23c   : > { %v1105_v16 = vrot.slane %v1104_v60, 1  ;;  %v1117_v13 = vadd.f32 %v1116_v12, %v1115_v58 }
 0x23e   : > { %v1106_v18 = vadd.f32 %v1105_v16, %v1104_v60  ;;  %v1118_v19 = vrot.slane %v1117_v13, 1 }
 0x240   : > { %v1119_v2 = vadd.f32 %v1118_v19, %v1117_v13  ;;  %v1120_v4 = vmul.f32 0.015625, %v1106_v18 }
 0x242   : > { %v1121_v14 = vmul.f32 0.015625, %v1119_v2  ;;  %v1122_v23 = vpack.c.bf16 %v1120_v4, %v1120_v4 }
 0x244   : > { %v1123_v21 = vpack.c.bf16 %v1121_v14, %v1121_v14 }
 0x246   : > { %1285 = vmatprep.mubr.bf16.mxu1 %v1123_v21 }
 0x247   : > { %1286 = vmatmul.mubr.bf16.vlgmr.msra.gmra.mxu1 %v1122_v23 }
 0x307   : > { %v1581_v24 = vpop.f32.mrf.mxu1 }
 0x309   : > { %v1582_v26 = vpop.f32.mrf.mxu1 }
 0x30a   : > { %v1583_v28 = vadd.f32 %v1582_v26, %v1581_v24 }
 0x30b   : > { %v1584_v29 = vpop.f32.mrf.mxu1 }
 0x30c   : > { %v1288_v30 = vadd.f32 %v1583_v28, %v1156_v25 }
 0x30d   : > { %v1585_v31 = vpop.f32.mrf.mxu1 }
 0x30e   : > { %1293 = vst [vmem:[%s270_s29] sm:$0x1] %v1288_v30 }
 0x30f   : > { %1761 = shalt.err (!%p1758_p3)
}
 0x310   : > { %s1762_s19 = scalar_lea.hbm %s2193_s14, 16  ;;  %s1766_s23 = scalar_lea.hbm %s2235_s7, 32 }
 0x311   : > { %p1763_p4 = scmp.ne.s32.totalorder %s2193_s14, %s1762_s19  ;;  %p1767_p9 = scmp.lt.s32.totalorder %s2193_s14, %s2235_s7 }
 0x312   : > { %p1768_p10 = scmp.lt.s32.totalorder %s1766_s23, %s1762_s19 }
 0x313   : > { %p1764_p7 = pnand %p1763_p4, %p1891_p5 }
 0x314   : > { %p1769_p11 = por %p1768_p10, %p1767_p9 }
 0x315   : > { %p1765_p8 = pneg %p1764_p7 }
 0x317   : > { %p1770_p12 = pnand %p1769_p11, %p1765_p8 }
 0x319   : > { %1773 = shalt.err (!%p1770_p12)
}
 0x31a   : > { %1603 = dma.vmem_to_hbm [thread:$0]  (%p1891_p5), %s1308_s8, 16, %s2193_s14, %s1295_s15  }
 0x31b PF: > { %p1609_p13 = scmp.ge.s32.totalorder %s1808_s27, 2  ;;  %s1319_s9 = sand.u32 1, %s1796_s24  }
 0x31c   : > { %s1320_s13 = scalar_lea.sflag [#allocation4], %s1319_s9 }
 0x31d   : > { %p1606_p0 = pnand %p1609_p13, %p1895_p6 }
 0x31f   : > { %p1607_p1 = pneg %p1606_p0 }
 0x321   : > { %1791 = dma.done.wait (%p1607_p1), %s1320_s13, 16  }
 0x322   : > { %1793 = vsyncadd (%p1607_p1), %s1320_s13, 4294967280  ;;  %p17_p2 = scmp.ge.s32.totalorder %s1878_s30, 4   ;;  %s2238_s24 = smov %s1800_s25 }
 0x323   : > { %s2239_s25 = smov %s1804_s26  ;;  %s2240_s26 = smov %s1889_s10 }
 0x324   : > { %s2241_s27 = smov %s1878_s30  ;;  %19 = sbr.rel (!%p17_p2) target bundleno = 3 (0x3), region = 83 }
 0x329   :  { %1324 = vsyncpa [#allocation4], 1 }
 0x32a   :  { %1326 = vsyncpa [#allocation4 + $0x1], 1 }

</bundles_post_ra>
